<compile_context>
chip_gen: v6e
topology: v6e:2x2x1
jax: 0.10.0
libtpu: 0.0.40
codegen_flags: <defaults>
</compile_context>

<pallas_src>
import functools

import jax
import jax.numpy as jnp
import numpy as np
from jax.experimental import pallas as pl
from jax.experimental.pallas import tpu as pltpu


def cbam_kernel(x_ref, w1t_ref, w2t_ref, wm_ref, o_ref, *, W, C_real, HW_real):
    x = x_ref[...]                                   # (Bb, Cp, HWp), input dtype
    Bb, Cp, HWp = x.shape
    f32 = jnp.float32

    if HWp != HW_real or Cp != C_real:
        neg = jnp.asarray(-jnp.inf, x.dtype)

    # ---------------- channel attention ----------------
    # mean/max over the spatial (lane) axis; accumulate in f32.
    avg_c = jnp.sum(x, axis=2, dtype=f32) * (1.0 / HW_real)        # (Bb, Cp)
    if HWp != HW_real:
        lane_ok = jax.lax.broadcasted_iota(jnp.int32, (1, 1, HWp), 2) < HW_real
        x_for_max = jnp.where(lane_ok, x, neg)
    else:
        x_for_max = x
    max_c = jnp.max(x_for_max, axis=2).astype(f32)                 # (Bb, Cp)

    # Shared fc (C -> Cr -> C): one pair of tiny MXU dots for avg+max stacked.
    pooled = jnp.concatenate([avg_c, max_c], axis=0)               # (2*Bb, Cp)
    h = jnp.maximum(jnp.dot(pooled, w1t_ref[...],
                            preferred_element_type=f32), 0.0)      # (2*Bb, Cr)
    mlp = jnp.dot(h, w2t_ref[...], preferred_element_type=f32)     # (2*Bb, Cp)
    ch_scale = jax.nn.sigmoid(mlp[:Bb] + mlp[Bb:]).astype(x.dtype)  # (Bb, Cp)
    # NOTE: ch_scale has C on lanes while x has C on sublanes; the relayout is
    # only Bb*Cp elements (a handful of vregs).  If profiles ever show XLU
    # pressure, compute the MLP transposed ((C, 2*Bb) layout) instead.
    x1 = x * ch_scale[:, :, None]                                  # (Bb, Cp, HWp)

    # ---------------- spatial attention ----------------
    avg_s = jnp.sum(x1, axis=1, dtype=f32) * (1.0 / C_real)        # (Bb, HWp)
    if Cp != C_real:
        chan_ok = jax.lax.broadcasted_iota(jnp.int32, (1, Cp, 1), 1) < C_real
        x1_for_max = jnp.where(chan_ok, x1, neg)
    else:
        x1_for_max = x1
    max_s = jnp.max(x1_for_max, axis=1).astype(f32)                # (Bb, HWp)

    # 3x3 conv over (H, W), padding=1, no bias.  Boundary masks are already
    # folded into the per-position tap weights wm (rows 0..8 avg, 9..17 max).
    wm = wm_ref[...]                                               # (18, HWp) f32
    acc = wm[4:5] * avg_s + wm[13:14] * max_s                      # center tap: no roll
    for t in range(9):
        if t == 4:
            continue
        i, j = divmod(t, 3)
        d = (i - 1) * W + (j - 1)                                  # flat tap offset
        sh = (-d) % HWp
        acc = (acc
               + wm[t:t + 1] * pltpu.roll(avg_s, sh, axis=1)
               + wm[9 + t:10 + t] * pltpu.roll(max_s, sh, axis=1))
    sp_scale = jax.nn.sigmoid(acc).astype(x.dtype)                 # (Bb, HWp)

    # Single lane-dense slab write (HWp % 128 == 0 by construction).
    o_ref[...] = (x1 * sp_scale[:, None, :]).astype(o_ref.dtype)


def _round_up(v, m):
    return ((v + m - 1) // m) * m


def _vmem_budget_bytes():
    """Scoped-VMEM limit to request: ~3/4 of the core's VMEM, capped at 96 MiB
    (=> 96 MiB on v5e/v6e's 128 MiB, ~48 MiB on v7x's 64 MiB per core)."""
    cap = 128 << 20
    try:
        cap = int(pltpu.get_tpu_info().vmem_capacity_bytes)
    except Exception:
        pass
    return int(min(cap * 3 // 4, 96 << 20))


def _pick_batch_block(B, per_image_bytes, vmem_limit_bytes):
    """Largest batch-block whose live set fits the VMEM budget while keeping
    >= 2 (preferably even) grid steps so v7x can use both TensorCores.

    Live set ~= 2x(in) + 2x(out) pipeline buffers + ~3 block-sized body
    temporaries; budget with a factor of 8 for margin, capped at 8 MiB/block."""
    max_block_bytes = min(8 << 20, max(1, vmem_limit_bytes // 8))
    cap = max(1, max_block_bytes // max(1, per_image_bytes))
    if B >= 2:
        cap = min(cap, B // 2)            # keep >= 2 grid steps (megacore)
    divisors = [d for d in range(1, B + 1) if B % d == 0 and d <= cap]
    even = [d for d in divisors if (B // d) % 2 == 0]
    pool = even or divisors or [1]
    return max(pool)


def cbam_forward(x_nchw, w1, w2, wconv, *, block_b=None, donate_input=False):
    """CBAM forward.  x_nchw: (B, C, H, W); w1: (Cr, C); w2: (C, Cr);
    wconv: (1, 2, 3, 3) with input channel 0 = avg map, 1 = max map.

    donate_input=True adds input_output_aliases={0: 0}; only enable it when the
    caller never reuses x afterwards (otherwise XLA inserts a defensive copy —
    a full extra HBM pass on this mem-bound kernel)."""
    B, C, H, W = x_nchw.shape
    HW = H * W
    Cr = int(w1.shape[0])
    dtype = x_nchw.dtype
    itemsize = jnp.dtype(dtype).itemsize

    # Pad to a lane-dense layout: HW -> multiple of 128 (lanes), C -> multiple
    # of the sublane packing (8 for 4-byte dtypes, 16 for 2-byte).
    HWp = _round_up(HW, 128)
    Cp = _round_up(C, 8 if itemsize >= 4 else 16)

    x = x_nchw.reshape(B, C, HW)
    padded = (HWp != HW) or (Cp != C)
    if padded:
        x = jnp.pad(x, ((0, 0), (0, Cp - C), (0, HWp - HW)))

    # 1x1-conv weights, pre-transposed (padded channels get zero weights).
    w1t = jnp.pad(jnp.asarray(w1, jnp.float32).T, ((0, Cp - C), (0, 0)))  # (Cp, Cr)
    w2t = jnp.pad(jnp.asarray(w2, jnp.float32).T, ((0, 0), (0, Cp - C)))  # (Cr, Cp)

    # Spatial-conv tap weights with the 3x3 boundary mask folded in on the host:
    #   wm[t, p]     = wconv[0, 0, i, j] * valid(tap t at output position p)
    #   wm[9 + t, p] = wconv[0, 1, i, j] * valid(tap t at output position p)
    p = jnp.arange(HWp)
    hh, ww = p // W, p % W
    masks = []
    for i in range(3):
        for j in range(3):
            di, dj = i - 1, j - 1
            masks.append((hh < H) & (hh + di >= 0) & (hh + di < H)
                         & (ww + dj >= 0) & (ww + dj < W))
    mask = jnp.stack(masks).astype(jnp.float32)                     # (9, HWp)
    wc = jnp.asarray(wconv, jnp.float32).reshape(2, 9)              # [in_c, tap]
    wm = jnp.concatenate([mask * wc[0][:, None],
                          mask * wc[1][:, None]], axis=0)           # (18, HWp)

    vmem_limit = _vmem_budget_bytes()
    if block_b is None:
        block_b = _pick_batch_block(B, Cp * HWp * itemsize, vmem_limit)
    assert B % block_b == 0, (B, block_b)
    grid = (B // block_b,)

    cost = pl.CostEstimate(
        flops=int(B * (8 * Cp * Cr + 8 * Cp * HWp + 40 * HWp)),
        transcendentals=int(B * (Cp + HWp)),
        bytes_accessed=int(2 * B * Cp * HWp * itemsize + (2 * Cp * Cr + 18 * HWp) * 4),
    )

    out = pl.pallas_call(
        functools.partial(cbam_kernel, W=W, C_real=C, HW_real=HW),
        out_shape=jax.ShapeDtypeStruct((B, Cp, HWp), dtype),
        grid=grid,
        in_specs=[
            pl.BlockSpec((block_b, Cp, HWp), lambda b: (b, 0, 0)),
            pl.BlockSpec((Cp, Cr), lambda b: (0, 0)),
            pl.BlockSpec((Cr, Cp), lambda b: (0, 0)),
            pl.BlockSpec((18, HWp), lambda b: (0, 0)),
        ],
        out_specs=pl.BlockSpec((block_b, Cp, HWp), lambda b: (b, 0, 0)),
        input_output_aliases={0: 0} if donate_input else {},
        cost_estimate=cost,
        compiler_params=pltpu.CompilerParams(
            dimension_semantics=("parallel",),
            vmem_limit_bytes=int(vmem_limit)),
    )(x, w1t, w2t, wm)

    if padded:
        out = out[:, :C, :HW]
    return out.reshape(B, C, H, W)


def cbam_ref(x, w1, w2, wconv):
    """Pure-JAX reference mirroring the PyTorch forward (NCHW)."""
    avg = jnp.mean(x, axis=(2, 3))                   # (B, C)
    mx = jnp.max(x, axis=(2, 3))                     # (B, C)

    def mlp(v):
        return jnp.maximum(v @ w1.T, 0.0) @ w2.T

    ch = jax.nn.sigmoid(mlp(avg) + mlp(mx))[:, :, None, None]
    x1 = x * ch
    avg_s = jnp.mean(x1, axis=1, keepdims=True)
    max_s = jnp.max(x1, axis=1, keepdims=True)
    inp = jnp.concatenate([avg_s, max_s], axis=1)    # (B, 2, H, W)
    conv = jax.lax.conv_general_dilated(
        inp, wconv, (1, 1), "SAME",
        dimension_numbers=("NCHW", "OIHW", "NCHW"))
    return x1 * jax.nn.sigmoid(conv)


if __name__ == "__main__":
    key = jax.random.PRNGKey(0)
    keys = jax.random.split(key, 8)

    def run_case(B, C, H, W, ratio, ks):
        Cr = max(1, C // ratio)
        kx, k1, k2, k3 = ks
        x = jax.random.normal(kx, (B, C, H, W), jnp.float32)
        w1 = jax.random.normal(k1, (Cr, C), jnp.float32) * 0.2        # Conv2d(C, Cr, 1, bias=False)
        w2 = jax.random.normal(k2, (C, Cr), jnp.float32) * 0.2        # Conv2d(Cr, C, 1, bias=False)
        wconv = jax.random.normal(k3, (1, 2, 3, 3), jnp.float32) * 0.2  # Conv2d(2, 1, 3, pad=1, bias=False)
        ref = jax.block_until_ready(cbam_ref(x, w1, w2, wconv))
        out = jax.block_until_ready(cbam_forward(x, w1, w2, wconv))
        assert out.shape == x.shape
        np.testing.assert_allclose(np.asarray(out), np.asarray(ref),
                                   atol=1e-3, rtol=1e-3)

    # CBAM(in_channels=32, ratio=4, kernel_size=3): lane-dense path (16*16 = 256).
    run_case(2, 32, 16, 16, 4, keys[:4])
    # Padded path: HW = 49 -> 128, C = 20 -> 24 (exercises lane/channel masking).
    run_case(2, 20, 7, 7, 4, keys[4:])

    print("KERNEL_OK")
</pallas_src>

<mosaic_0001>
module attributes {stable_mosaic.version = 11 : i64} {
  func.func @cbam_kernel(%arg0: i32, %arg1: memref<1x32x256xf32, #tpu.memory_space<vmem>>, %arg2: memref<32x8xf32, #tpu.memory_space<vmem>>, %arg3: memref<8x32xf32, #tpu.memory_space<vmem>>, %arg4: memref<18x256xf32, #tpu.memory_space<vmem>>, %arg5: memref<1x32x256xf32, #tpu.memory_space<vmem>>) attributes {dimension_semantics = [#tpu.dimension_semantics<parallel>], iteration_bounds = array<i64: 2>, scalar_prefetch = 0 : i64, scratch_operands = 0 : i64, tpu.core_type = #tpu.core_type<tc>, window_params = [{transform_indices = @transform_0, window_bounds = array<i64: 1, 32, 256>}, {pipeline_mode = #tpu.pipeline_mode<synchronous>, transform_indices = @transform_1, window_bounds = array<i64: 32, 8>}, {pipeline_mode = #tpu.pipeline_mode<synchronous>, transform_indices = @transform_2, window_bounds = array<i64: 8, 32>}, {pipeline_mode = #tpu.pipeline_mode<synchronous>, transform_indices = @transform_3, window_bounds = array<i64: 18, 256>}, {transform_indices = @transform_4, window_bounds = array<i64: 1, 32, 256>}]} {
    %c0 = arith.constant 0 : index
    %c0_0 = arith.constant 0 : index
    %c0_1 = arith.constant 0 : index
    %0 = vector.load %arg1[%c0, %c0_0, %c0_1] : memref<1x32x256xf32, #tpu.memory_space<vmem>>, vector<1x32x256xf32>
    %cst = arith.constant dense<0.000000e+00> : vector<1x32xf32>
    %1 = vector.multi_reduction <add>, %0, %cst [2] : vector<1x32x256xf32> to vector<1x32xf32>
    %cst_2 = arith.constant 3.906250e-03 : f32
    %2 = vector.broadcast %cst_2 : f32 to vector<1x32xf32>
    %3 = arith.mulf %1, %2 : vector<1x32xf32>
    %cst_3 = arith.constant dense<0xFF800000> : vector<1x32xf32>
    %4 = vector.multi_reduction <maximumf>, %0, %cst_3 [2] : vector<1x32x256xf32> to vector<1x32xf32>
    %5 = tpu.concatenate %3, %4 in 0 : vector<1x32xf32>, vector<1x32xf32> -> vector<2x32xf32>
    %c0_4 = arith.constant 0 : index
    %c0_5 = arith.constant 0 : index
    %6 = vector.load %arg2[%c0_4, %c0_5] : memref<32x8xf32, #tpu.memory_space<vmem>>, vector<32x8xf32>
    %cst_6 = arith.constant dense<0.000000e+00> : vector<2x8xf32>
    %7 = tpu.matmul %5, %6, %cst_6 {dimension_numbers = #tpu.dot_dimension_numbers<[1], [0], [0], [1], [0, 0, 1, 1], [], []>} : vector<2x32xf32>, vector<32x8xf32>, vector<2x8xf32> -> vector<2x8xf32>
    %cst_7 = arith.constant 0.000000e+00 : f32
    %8 = vector.broadcast %cst_7 : f32 to vector<2x8xf32>
    %9 = arith.maximumf %7, %8 : vector<2x8xf32>
    %c0_8 = arith.constant 0 : index
    %c0_9 = arith.constant 0 : index
    %10 = vector.load %arg3[%c0_8, %c0_9] : memref<8x32xf32, #tpu.memory_space<vmem>>, vector<8x32xf32>
    %cst_10 = arith.constant dense<0.000000e+00> : vector<2x32xf32>
    %11 = tpu.matmul %9, %10, %cst_10 {dimension_numbers = #tpu.dot_dimension_numbers<[1], [0], [0], [1], [0, 0, 1, 1], [], []>} : vector<2x8xf32>, vector<8x32xf32>, vector<2x32xf32> -> vector<2x32xf32>
    %12 = vector.extract_strided_slice %11 {offsets = [0, 0], sizes = [1, 32], strides = [1, 1]} : vector<2x32xf32> to vector<1x32xf32>
    %13 = vector.extract_strided_slice %11 {offsets = [1, 0], sizes = [1, 32], strides = [1, 1]} : vector<2x32xf32> to vector<1x32xf32>
    %14 = arith.addf %12, %13 : vector<1x32xf32>
    %15 = arith.negf %14 : vector<1x32xf32>
    %16 = math.exp %15 : vector<1x32xf32>
    %cst_11 = arith.constant 1.000000e+00 : f32
    %17 = vector.broadcast %cst_11 : f32 to vector<1x32xf32>
    %18 = arith.addf %17, %16 : vector<1x32xf32>
    %19 = arith.divf %17, %18 : vector<1x32xf32>
    %20 = vector.shape_cast %19 : vector<1x32xf32> to vector<1x32x1xf32>
    %21 = vector.broadcast %20 : vector<1x32x1xf32> to vector<1x32x256xf32>
    %22 = arith.mulf %0, %21 : vector<1x32x256xf32>
    %cst_12 = arith.constant dense<0.000000e+00> : vector<1x256xf32>
    %23 = vector.multi_reduction <add>, %22, %cst_12 [1] : vector<1x32x256xf32> to vector<1x256xf32>
    %cst_13 = arith.constant 3.125000e-02 : f32
    %24 = vector.broadcast %cst_13 : f32 to vector<1x256xf32>
    %25 = arith.mulf %23, %24 : vector<1x256xf32>
    %cst_14 = arith.constant dense<0xFF800000> : vector<1x256xf32>
    %26 = vector.multi_reduction <maximumf>, %22, %cst_14 [1] : vector<1x32x256xf32> to vector<1x256xf32>
    %c0_15 = arith.constant 0 : index
    %c0_16 = arith.constant 0 : index
    %27 = vector.load %arg4[%c0_15, %c0_16] : memref<18x256xf32, #tpu.memory_space<vmem>>, vector<18x256xf32>
    %28 = vector.extract_strided_slice %27 {offsets = [4, 0], sizes = [1, 256], strides = [1, 1]} : vector<18x256xf32> to vector<1x256xf32>
    %29 = arith.mulf %28, %25 : vector<1x256xf32>
    %30 = vector.extract_strided_slice %27 {offsets = [13, 0], sizes = [1, 256], strides = [1, 1]} : vector<18x256xf32> to vector<1x256xf32>
    %31 = arith.mulf %30, %26 : vector<1x256xf32>
    %32 = arith.addf %29, %31 : vector<1x256xf32>
    %33 = vector.extract_strided_slice %27 {offsets = [0, 0], sizes = [1, 256], strides = [1, 1]} : vector<18x256xf32> to vector<1x256xf32>
    %c17_i32 = arith.constant 17 : i32
    %34 = tpu.dynamic_rotate %25 by %c17_i32 dim 1 : vector<1x256xf32>, i32 -> vector<1x256xf32>
    %35 = arith.mulf %33, %34 : vector<1x256xf32>
    %36 = arith.addf %32, %35 : vector<1x256xf32>
    %37 = vector.extract_strided_slice %27 {offsets = [9, 0], sizes = [1, 256], strides = [1, 1]} : vector<18x256xf32> to vector<1x256xf32>
    %c17_i32_17 = arith.constant 17 : i32
    %38 = tpu.dynamic_rotate %26 by %c17_i32_17 dim 1 : vector<1x256xf32>, i32 -> vector<1x256xf32>
    %39 = arith.mulf %37, %38 : vector<1x256xf32>
    %40 = arith.addf %36, %39 : vector<1x256xf32>
    %41 = vector.extract_strided_slice %27 {offsets = [1, 0], sizes = [1, 256], strides = [1, 1]} : vector<18x256xf32> to vector<1x256xf32>
    %c16_i32 = arith.constant 16 : i32
    %42 = tpu.dynamic_rotate %25 by %c16_i32 dim 1 : vector<1x256xf32>, i32 -> vector<1x256xf32>
    %43 = arith.mulf %41, %42 : vector<1x256xf32>
    %44 = arith.addf %40, %43 : vector<1x256xf32>
    %45 = vector.extract_strided_slice %27 {offsets = [10, 0], sizes = [1, 256], strides = [1, 1]} : vector<18x256xf32> to vector<1x256xf32>
    %c16_i32_18 = arith.constant 16 : i32
    %46 = tpu.dynamic_rotate %26 by %c16_i32_18 dim 1 : vector<1x256xf32>, i32 -> vector<1x256xf32>
    %47 = arith.mulf %45, %46 : vector<1x256xf32>
    %48 = arith.addf %44, %47 : vector<1x256xf32>
    %49 = vector.extract_strided_slice %27 {offsets = [2, 0], sizes = [1, 256], strides = [1, 1]} : vector<18x256xf32> to vector<1x256xf32>
    %c15_i32 = arith.constant 15 : i32
    %50 = tpu.dynamic_rotate %25 by %c15_i32 dim 1 : vector<1x256xf32>, i32 -> vector<1x256xf32>
    %51 = arith.mulf %49, %50 : vector<1x256xf32>
    %52 = arith.addf %48, %51 : vector<1x256xf32>
    %53 = vector.extract_strided_slice %27 {offsets = [11, 0], sizes = [1, 256], strides = [1, 1]} : vector<18x256xf32> to vector<1x256xf32>
    %c15_i32_19 = arith.constant 15 : i32
    %54 = tpu.dynamic_rotate %26 by %c15_i32_19 dim 1 : vector<1x256xf32>, i32 -> vector<1x256xf32>
    %55 = arith.mulf %53, %54 : vector<1x256xf32>
    %56 = arith.addf %52, %55 : vector<1x256xf32>
    %57 = vector.extract_strided_slice %27 {offsets = [3, 0], sizes = [1, 256], strides = [1, 1]} : vector<18x256xf32> to vector<1x256xf32>
    %c1_i32 = arith.constant 1 : i32
    %58 = tpu.dynamic_rotate %25 by %c1_i32 dim 1 : vector<1x256xf32>, i32 -> vector<1x256xf32>
    %59 = arith.mulf %57, %58 : vector<1x256xf32>
    %60 = arith.addf %56, %59 : vector<1x256xf32>
    %61 = vector.extract_strided_slice %27 {offsets = [12, 0], sizes = [1, 256], strides = [1, 1]} : vector<18x256xf32> to vector<1x256xf32>
    %c1_i32_20 = arith.constant 1 : i32
    %62 = tpu.dynamic_rotate %26 by %c1_i32_20 dim 1 : vector<1x256xf32>, i32 -> vector<1x256xf32>
    %63 = arith.mulf %61, %62 : vector<1x256xf32>
    %64 = arith.addf %60, %63 : vector<1x256xf32>
    %65 = vector.extract_strided_slice %27 {offsets = [5, 0], sizes = [1, 256], strides = [1, 1]} : vector<18x256xf32> to vector<1x256xf32>
    %c255_i32 = arith.constant 255 : i32
    %66 = tpu.dynamic_rotate %25 by %c255_i32 dim 1 : vector<1x256xf32>, i32 -> vector<1x256xf32>
    %67 = arith.mulf %65, %66 : vector<1x256xf32>
    %68 = arith.addf %64, %67 : vector<1x256xf32>
    %69 = vector.extract_strided_slice %27 {offsets = [14, 0], sizes = [1, 256], strides = [1, 1]} : vector<18x256xf32> to vector<1x256xf32>
    %c255_i32_21 = arith.constant 255 : i32
    %70 = tpu.dynamic_rotate %26 by %c255_i32_21 dim 1 : vector<1x256xf32>, i32 -> vector<1x256xf32>
    %71 = arith.mulf %69, %70 : vector<1x256xf32>
    %72 = arith.addf %68, %71 : vector<1x256xf32>
    %73 = vector.extract_strided_slice %27 {offsets = [6, 0], sizes = [1, 256], strides = [1, 1]} : vector<18x256xf32> to vector<1x256xf32>
    %c241_i32 = arith.constant 241 : i32
    %74 = tpu.dynamic_rotate %25 by %c241_i32 dim 1 : vector<1x256xf32>, i32 -> vector<1x256xf32>
    %75 = arith.mulf %73, %74 : vector<1x256xf32>
    %76 = arith.addf %72, %75 : vector<1x256xf32>
    %77 = vector.extract_strided_slice %27 {offsets = [15, 0], sizes = [1, 256], strides = [1, 1]} : vector<18x256xf32> to vector<1x256xf32>
    %c241_i32_22 = arith.constant 241 : i32
    %78 = tpu.dynamic_rotate %26 by %c241_i32_22 dim 1 : vector<1x256xf32>, i32 -> vector<1x256xf32>
    %79 = arith.mulf %77, %78 : vector<1x256xf32>
    %80 = arith.addf %76, %79 : vector<1x256xf32>
    %81 = vector.extract_strided_slice %27 {offsets = [7, 0], sizes = [1, 256], strides = [1, 1]} : vector<18x256xf32> to vector<1x256xf32>
    %c240_i32 = arith.constant 240 : i32
    %82 = tpu.dynamic_rotate %25 by %c240_i32 dim 1 : vector<1x256xf32>, i32 -> vector<1x256xf32>
    %83 = arith.mulf %81, %82 : vector<1x256xf32>
    %84 = arith.addf %80, %83 : vector<1x256xf32>
    %85 = vector.extract_strided_slice %27 {offsets = [16, 0], sizes = [1, 256], strides = [1, 1]} : vector<18x256xf32> to vector<1x256xf32>
    %c240_i32_23 = arith.constant 240 : i32
    %86 = tpu.dynamic_rotate %26 by %c240_i32_23 dim 1 : vector<1x256xf32>, i32 -> vector<1x256xf32>
    %87 = arith.mulf %85, %86 : vector<1x256xf32>
    %88 = arith.addf %84, %87 : vector<1x256xf32>
    %89 = vector.extract_strided_slice %27 {offsets = [8, 0], sizes = [1, 256], strides = [1, 1]} : vector<18x256xf32> to vector<1x256xf32>
    %c239_i32 = arith.constant 239 : i32
    %90 = tpu.dynamic_rotate %25 by %c239_i32 dim 1 : vector<1x256xf32>, i32 -> vector<1x256xf32>
    %91 = arith.mulf %89, %90 : vector<1x256xf32>
    %92 = arith.addf %88, %91 : vector<1x256xf32>
    %93 = vector.extract_strided_slice %27 {offsets = [17, 0], sizes = [1, 256], strides = [1, 1]} : vector<18x256xf32> to vector<1x256xf32>
    %c239_i32_24 = arith.constant 239 : i32
    %94 = tpu.dynamic_rotate %26 by %c239_i32_24 dim 1 : vector<1x256xf32>, i32 -> vector<1x256xf32>
    %95 = arith.mulf %93, %94 : vector<1x256xf32>
    %96 = arith.addf %92, %95 : vector<1x256xf32>
    %97 = arith.negf %96 : vector<1x256xf32>
    %98 = math.exp %97 : vector<1x256xf32>
    %cst_25 = arith.constant 1.000000e+00 : f32
    %99 = vector.broadcast %cst_25 : f32 to vector<1x256xf32>
    %100 = arith.addf %99, %98 : vector<1x256xf32>
    %101 = arith.divf %99, %100 : vector<1x256xf32>
    %102 = vector.shape_cast %101 : vector<1x256xf32> to vector<1x1x256xf32>
    %103 = vector.broadcast %102 : vector<1x1x256xf32> to vector<1x32x256xf32>
    %104 = arith.mulf %22, %103 : vector<1x32x256xf32>
    %c0_26 = arith.constant 0 : index
    %c0_27 = arith.constant 0 : index
    %c0_28 = arith.constant 0 : index
    %105 = vector.load %arg5[%c0_26, %c0_27, %c0_28] : memref<1x32x256xf32, #tpu.memory_space<vmem>>, vector<1x32x256xf32>
    tpu.vector_store %arg5[%c0_26, %c0_27, %c0_28], %104 {strides = array<i32>} : memref<1x32x256xf32, #tpu.memory_space<vmem>>, vector<1x32x256xf32>,
    return
  }
  func.func @transform_0(%arg0: i32) -> (i32, i32, i32) {
    %c0_i32 = arith.constant 0 : i32
    %c0_i32_0 = arith.constant 0 : i32
    %c0_i32_1 = arith.constant 0 : i32
    return %arg0, %c0_i32, %c0_i32_0 : i32, i32, i32
  }
  func.func @transform_1(%arg0: i32) -> (i32, i32) {
    %c0_i32 = arith.constant 0 : i32
    %c0_i32_0 = arith.constant 0 : i32
    %c0_i32_1 = arith.constant 0 : i32
    return %c0_i32, %c0_i32_0 : i32, i32
  }
  func.func @transform_2(%arg0: i32) -> (i32, i32) {
    %c0_i32 = arith.constant 0 : i32
    %c0_i32_0 = arith.constant 0 : i32
    %c0_i32_1 = arith.constant 0 : i32
    return %c0_i32, %c0_i32_0 : i32, i32
  }
  func.func @transform_3(%arg0: i32) -> (i32, i32) {
    %c0_i32 = arith.constant 0 : i32
    %c0_i32_0 = arith.constant 0 : i32
    %c0_i32_1 = arith.constant 0 : i32
    return %c0_i32, %c0_i32_0 : i32, i32
  }
  func.func @transform_4(%arg0: i32) -> (i32, i32, i32) {
    %c0_i32 = arith.constant 0 : i32
    %c0_i32_0 = arith.constant 0 : i32
    %c0_i32_1 = arith.constant 0 : i32
    return %arg0, %c0_i32, %c0_i32_0 : i32, i32, i32
  }
}

</mosaic_0001>

<bundles_post_ra>
// kernel: tpu_custom_call.1
= control target key start
LH: loop header
LB: loop body
LE: loop exit
PB: predicated region body
PF: predicated region fallthrough
CT: control target
= control target key end

     0   :  { %9 = vsyncpa [#allocation3], 0  ;;  %s1771_s0 = inlined_call_operand.hbm [shape: f32[2,32,256], index: 0, kind: input, shape index: {}]   ;;  %s1772_s1 = inlined_call_operand.vmem [shape: f32[32,8], index: 1, kind: input, shape index: {}]   ;;  %s1773_s2 = inlined_call_operand.vmem [shape: f32[8,32], index: 2, kind: input, shape index: {}]   ;;  %s1774_s3 = inlined_call_operand.hbm [shape: f32[18,256], index: 3, kind: input, shape index: {}]   ;;  %s1775_s4 = inlined_call_operand.hbm [shape: f32[2,32,256], index: 4, kind: output, shape index: {}]  }
   0x1   :  { %11 = vsyncpa [#allocation3 + $0x1], 0 }
   0x2   :  { %12 = vsyncpa [#allocation6], 0 }
   0x3   :  { %13 = vsyncpa [#allocation4], 0 }
   0x4   :  { %15 = vsyncpa [#allocation4 + $0x1], 0  ;;  %s1334_s15 = smov 0   ;;  %s1336_s16 = smov 0  }
   0x5   :  { %s1338_s17 = smov 0   ;;  %s1340_s18 = smov 0  }
   0x6 LB: > { %s1355_s19 = sadd.s32 4294967295, %s1291_s18   ;;  %s1041_s20 = sadd.s32 4294967294, %s1291_s18   ;;  %s1291_s18 = sphi %s1340_s18, %s1797_s18   ;;  %s1287_s17 = sphi %s1338_s17, %s1796_s17   ;;  %s1283_s16 = sphi %s1336_s16, %s1795_s16   ;;  %s1279_s15 = sphi %s1334_s15, %s1794_s15  }
   0x7   : > { %p41_p0 = scmp.ne.s32.totalorder %s1283_s16, %s1279_s15  ;;  %p1776_p1 = scmp.eq.s32.totalorder %s1355_s19, 0 }
   0x8   : > { %p134_p3 = scmp.eq.s32.totalorder %s1041_s20, 1  ;;  %p1042_p5 = scmp.ge.s32.totalorder %s1291_s18, 1 }
   0x9   : > { %p1364_p4 = por %p1776_p1, %p41_p0  ;;  %p141_p7 = scmp.lt.s32.totalorder %s1291_s18, 3 }
   0xa   : > { %p1369_p6 = por %p134_p3, %p41_p0  ;;  %s1293_s24 = smov [#allocation5]  }
   0xb   : > { %s1780_s21 = scalar_select %p1364_p4, 1, 0 }
   0xc   : > { %s1781_s22 = scalar_select %p1369_p6, 1, 0 }
   0xd   : > { %p1374_p8 = pnand %p1042_p5, %p141_p7  ;;  %s159_s25 = sshll.u32 %s1293_s24, 4  ;;  %s160_s25 = int_to_ptr.vmem [resolvable:$true] %s159_s25 }
   0xe   : > { %s1388_s27 = sadd.s32 1, %s1291_s18   ;;  %s28_s28 = sadd.s32 1, %s1287_s17 }
   0xf   : > { %s1782_s23 = scalar_select %p1374_p8, 1, 0 }
  0x10   : > { %p1095_p9 = pneg %p1374_p8  ;;  %s25_s29 = ssub.s32 %s1291_s18, %s1388_s27 }
  0x11   : > { %s1180_s30 = scalar_lea.vmem %s160_s25, 768  ;;  %p1188_p5 = scmp.lt.s32.totalorder %s160_s25, %s160_s25 }
  0x12   : > { %p1383_p11 = pnand %p1095_p9, %p1776_p1  ;;  %p1181_p13 = scmp.ne.s32.totalorder %s160_s25, %s1180_s30 }
  0x13   : > { %p1189_p7 = scmp.lt.s32.totalorder %s1180_s30, %s1180_s30 }
  0x14   : > { %p1171_p12 = pneg %p1383_p11 }
  0x15   : > { %p1190_p10 = por %p1189_p7, %p1188_p5 }
  0x16   : > { %p1183_p0 = pnand %p1181_p13, %p1171_p12 }
  0x18   : > { %p1184_p3 = pneg %p1183_p0 }
  0x1a   : > { %p1191_p2 = pnand %p1190_p10, %p1184_p3 }
  0x1c   : > { %1194 = shalt.err (!%p1191_p2)
}
  0x1d   : > { %s1294_s5 = smov 256   ;;  %s1295_s6 = smov 16  }
  0x1e   : > { %1098 = dma.hbm_to_vmem [thread:$0]  (!%p1383_p11), %s1774_s3, 768, %s160_s25, [#allocation6], %s1294_s5, %s1294_s5, %s1295_s6  }
  0x1f   : > { %p26_p2 = scmp.eq.s32.totalorder %s25_s29, 0  ;;  %p35_p9 = scmp.ne.s32.totalorder %s1287_s17, %s1283_s16 }
  0x20   : > { %p36_p10 = scmp.eq.s32.totalorder %s1291_s18, 0  ;;  %p1108_p12 = scmp.lt.s32.totalorder %s1291_s18, 2 }
  0x21   : > { %s1408_s9 = scalar_select %p26_p2, %s1287_s17, %s28_s28  }
  0x22   : > { %p37_p13 = por %p36_p10, %p35_p9  ;;  %p1784_p0 = scmp.eq.s32.totalorder %s1355_s19, 1 }
  0x23   : > { %s173_s11 = sand.u32 1, %s1287_s17   ;;  %s1062_s12 = sshll.u32 %s1291_s18, 10 }
  0x24   : > { %p1412_p3 = por %p1784_p0, %p35_p9  ;;  %s1045_s13 = sshll.u32 %s173_s11, 6 }
  0x25   : > { %s1421_s24 = scalar_lea.hbm %s1771_s0, %s1062_s12  ;;  %s177_s25 = scalar_lea.vmem [#allocation2], %s1045_s13 }
  0x26   : > { %s1785_s10 = scalar_select %p1412_p3, 1, 0 }
  0x27   : > { %s184_s26 = sshll.u32 %s177_s25, 4  ;;  %p1423_p11 = pnand %p1108_p12, %p37_p13  ;;  %s1427_s26 = int_to_ptr.vmem [resolvable:$true] %s184_s26 }
  0x28   : > { %s1429_s29 = scalar_lea.sflag [#allocation3], %s173_s11  ;;  %s1195_s30 = scalar_lea.hbm %s1421_s24, 1024 }
  0x29   : > { %p1196_p5 = scmp.ne.s32.totalorder %s1421_s24, %s1195_s30  ;;  %p1197_p7 = pneg %p1423_p11 }
  0x2a   : > { %s1200_s12 = scalar_lea.hbm %s1771_s0, 2048  ;;  %p1201_p10 = scmp.lt.s32.totalorder %s1421_s24, %s1771_s0 }
  0x2b   : > { %p1198_p2 = pnand %p1197_p7, %p1196_p5  ;;  %p1202_p12 = scmp.lt.s32.totalorder %s1200_s12, %s1195_s30 }
  0x2d   : > { %p1199_p9 = pneg %p1198_p2  ;;  %p1203_p13 = por %p1202_p12, %p1201_p10 }
  0x2f   : > { %p1204_p0 = pnand %p1203_p13, %p1199_p9 }
  0x31   : > { %1207 = shalt.err (!%p1204_p0)
}
  0x32   : > { %s1208_s11 = scalar_lea.vmem %s1427_s26, 1024  ;;  %s1296_s20 = smov [#allocation2]  }
  0x33   : > { %p1209_p1 = scmp.ne.s32.totalorder %s1427_s26, %s1208_s11  ;;  %s1213_s25 = sshll.u32 %s1296_s20, 4  ;;  %s1214_s25 = int_to_ptr.vmem [resolvable:$false] %s1213_s25 }
  0x34   : > { %s1215_s7 = scalar_lea.vmem %s1214_s25, 2048  ;;  %p1216_p2 = scmp.lt.s32.totalorder %s1427_s26, %s1214_s25 }
  0x35   : > { %p1211_p6 = pnand %p1209_p1, %p1197_p7  ;;  %p1217_p3 = scmp.lt.s32.totalorder %s1215_s7, %s1208_s11 }
  0x37   : > { %p1212_p5 = pneg %p1211_p6  ;;  %p1218_p4 = por %p1217_p3, %p1216_p2 }
  0x39   : > { %p1219_p8 = pnand %p1218_p4, %p1212_p5 }
  0x3b   : > { %1222 = shalt.err (!%p1219_p8)
}
  0x3c   : > { %1102 = dma.hbm_to_vmem [thread:$0]  (!%p1423_p11), %s1421_s24, 1024, %s1427_s26, %s1429_s29, %s1294_s5, %s1294_s5, %s1295_s6  }
  0x3d   : > { %p1787_p1 = scmp.ne.s32.totalorder %s1782_s23, 0 }
  0x3e   : > { %s1456_s30 = sand.u32 (!%p1787_p1), 1, %s1283_s16   ;;  %p1788_p4 = scmp.ne.s32.totalorder (!%p1787_p1), %s1780_s21, 0 }
  0x3f   : > { %196 = sbr.rel (%p1787_p1) target bundleno = 1035 (0x40b), region = 36  ;;  %s1049_s8 = sshll.u32 (!%p1787_p1), %s1456_s30, 6 }
  0x40   : > { %s199_s12 = scalar_lea.sflag (!%p1787_p1), [#allocation3], %s1456_s30  ;;  %s202_s28 = scalar_lea.vmem (!%p1787_p1), [#allocation2], %s1049_s8 }
  0x44   : > { %1266 = dma.done.wait (%p1788_p4), %s199_s12, 1024  }
  0x45   : > { %1268 = vsyncadd (%p1788_p4), %s199_s12, 4294966272  ;;  %p1789_p6 = scmp.eq.s32.totalorder %s1355_s19, 0 }
  0x47   : > { %1270 = dma.done.wait (%p1789_p6), [#allocation6], 768   ;;  %p1790_p8 = pmov %p1789_p6 }
  0x48   : > { %v1470_v0 = vld [vmem:[%s202_s28 + $0x20] sm:$0xff]  ;;  %v1472_v1 = vld [vmem:[%s202_s28 + $0x28] sm:$0xff]  ;;  %v1480_v5 = vld [vmem:[%s202_s28 + $0x30] sm:$0xff]  ;;  %v1297_v16 = vmov 0.0   ;;  %vm1298_vm0 = vmmov 0   ;;  %v271_v21 = vlaneseq  ;;  %vm282_vm1 = vcmask 130112  }
  0x49   : > { %1272 = vsyncadd (%p1790_p8), [#allocation6], 4294966528  ;;  %v1474_v2 = vld [vmem:[%s202_s28] sm:$0xff]  ;;  %v245_v3 = vadd.f32 %v1472_v1, %v1470_v0  ;;  %v1478_v4 = vld [vmem:[%s202_s28 + $0x8] sm:$0xff]  ;;  %v261_v15 = vmax.f32 %v1470_v0, %v1472_v1  ;;  %1071 = vmatprep.subr.mxu0 %v1297_v16  ;;  %1082 = vmatprep.subr.mxu1 %v1297_v16  ;;  %vm289_vm2 = vcmask 195712   ;;  %vm296_vm3 = vcmask 261312  }
  0x4a   : > { %v1482_v6 = vld [vmem:[%s202_s28 + $0x38] sm:$0xff]  ;;  %v239_v7 = vadd.f32 %v1478_v4, %v1474_v2  ;;  %v1486_v8 = vld [vmem:[%s202_s28 + $0x10] sm:$0xff]  ;;  %v255_v13 = vmax.f32 %v1474_v2, %v1478_v4  ;;  %v326_v19 = vld [vmem:[%s1772_s1 + $0x8] sm:$0xff]  ;;  %1079 = vmatprep.mubr.msk.f32.mxu0 %vm1298_vm0, %v1297_v16  ;;  %1084 = vmatprep.mubr.msk.f32.mxu1 %vm1298_vm0, %v1297_v16  ;;  %v1514_v22 = vand.u32 127, %v271_v21  ;;  %v1517_v25 = vshrl.u32 %v271_v21, 7  ;;  %s1299_s20 = smov 17  }
  0x4b   : > { %v1488_v9 = vld [vmem:[%s202_s28 + $0x18] sm:$0xff]  ;;  %246 = vadd.xlane.f32.xlu1 %v245_v3  ;;  %v248_v10 = vadd.f32 %v1482_v6, %v1480_v5  ;;  %v264_v14 = vmax.f32 %v1480_v5, %v1482_v6  ;;  %v327_v18 = vld [vmem:[%s1772_s1 + $0x10] sm:$0xff]  ;;  %v325_v20 = vld [vmem:[%s1772_s1] sm:$0xff]  ;;  %vm323_vm4 = vcmask 1040384   ;;  %vm329_vm5 = vcmask 261120   ;;  %s1300_s25 = smov 16  }
  0x4c   : > { %240 = vadd.xlane.f32.xlu0 %v239_v7  ;;  %v242_v11 = vadd.f32 %v1488_v9, %v1486_v8  ;;  %v258_v12 = vmax.f32 %v1486_v8, %v1488_v9  ;;  %v328_v17 = vld [vmem:[%s1772_s1 + $0x18] sm:$0xff]  ;;  %v277_v24 = vadd.s32 4294967288, %v1514_v22  ;;  %v284_v27 = vadd.s32 4294967280, %v1514_v22  ;;  %v404_v58 = vld [vmem:[%s1773_s2] sm:$0xff]  ;;  %s1301_s7 = smov 15   ;;  %s1302_s12 = smov 1  }
  0x4d   : > { %1072 = vmatpush3.msra.mxu0 %v328_v17  ;;  %v275_v30 = vsub.s32 %v1514_v22, %v1517_v25  ;;  %v291_v32 = vadd.s32 4294967272, %v1514_v22  ;;  %1083 = vmatpush3.msra.mxu1 %v404_v58  ;;  %vm405_vm6 = vcmask 64512   ;;  %s1303_s28 = smov 127   ;;  %s1304_s21 = smov 113   ;;  %vm576_vm7 = vcmp.lt.s32.totalorder %v1514_v22, 17 }
  0x4e   : > { %1073 = vmatprep.subr.mxu0 %v1297_v16  ;;  %v280_v29 = vsub.s32 %v277_v24, %v1517_v25  ;;  %v287_v35 = vsub.s32 %v284_v27, %v1517_v25  ;;  %s1305_s23 = smov 112   ;;  %s1306_s5 = smov 111   ;;  %vm615_vm8 = vcmp.lt.s32.totalorder %v1514_v22, 16  ;;  %vm660_vm9 = vcmp.lt.s32.totalorder %v1514_v22, 15 }
  0x4f   : > { %249 = vadd.xlane.f32.xlu1 %v248_v10  ;;  %1074 = vmatpush3.msra.mxu0 %v327_v18  ;;  %v294_v40 = vsub.s32 %v291_v32, %v1517_v25  ;;  %vm705_vm10 = vcmp.lt.s32.totalorder %v1514_v22, 1  ;;  %vm744_vm11 = vcmp.lt.s32.totalorder %v1514_v22, 127  ;;  %vm789_vm12 = vcmp.lt.s32.totalorder %v1514_v22, 113  ;;  %s1063_s6 = sshll.u32 %s1355_s19, 10  ;;  %s230_s24 = scalar_lea.vmem [#allocation7], %s1049_s8 }
  0x50   : > { %243 = vadd.xlane.f32.xlu0 %v242_v11  ;;  %1075 = vmatprep.subr.mxu0 %v1297_v16  ;;  %vm834_vm13 = vcmp.lt.s32.totalorder %v1514_v22, 112  ;;  %vm873_vm14 = vcmp.lt.s32.totalorder %v1514_v22, 111  ;;  %s958_s26 = sshll.u32 %s230_s24, 4  ;;  %s1721_s14 = scalar_lea.hbm %s1775_s4, %s1063_s6  ;;  %s1727_s26 = int_to_ptr.vmem [resolvable:$true] %s958_s26 }
  0x51   : > { %1076 = vmatpush3.msra.mxu0 %v326_v19  ;;  %s945_s19 = scalar_lea.sflag [#allocation4], %s1456_s30  ;;  %s1223_s8 = scalar_lea.vmem %s1727_s26, 1024 }
  0x52   : > { %1077 = vmatprep.subr.mxu0 %v1297_v16  ;;  %p1224_p3 = scmp.ne.s32.totalorder %s1727_s26, %s1223_s8  ;;  %p1791_p11 = scmp.ne.s32.totalorder %s1785_s10, 0 }
  0x53   : > { %259 = vmax.xlane.f32.xlu1 %v258_v12  ;;  %1078 = vmatpush3.msra.mxu0 %v325_v20  ;;  %s1307_s11 = smov [#allocation7]  }
  0x54   : > { %256 = vmax.xlane.f32.xlu0 %v255_v13  ;;  %v491_v13 = vsub.s32 0, %v1517_v25  ;;  %p1225_p7 = pnand %p1224_p3, %p1791_p11 }
  0x56   : > { %p1226_p9 = pneg %p1225_p7 }
  0x57   : > { %265 = vmax.xlane.f32.xlu1 %v264_v14 }
  0x58   : > { %262 = vmax.xlane.f32.xlu0 %v261_v15 }
  0xd4   : > { %v247_v23 = vpop.xlane.xlu1 %246 }
  0xd5   : > { %v241_v26 = vpop.xlane.xlu0 %240  ;;  %v253_v36 = vmul.f32 0.00390625, %v247_v23 }
  0xd6   : > { %v251_v31 = vmul.f32 0.00390625, %v241_v26 }
  0xd7   : > { %v288_v46 = vrot.slane %v253_v36, %v287_v35 }
  0xd8   : > { %v250_v28 = vpop.xlane.xlu1 %249  ;;  %v276_v39 = vrot.slane %v251_v31, %v275_v30 }
  0xd9   : > { %v244_v33 = vpop.xlane.xlu0 %243  ;;  %v254_v41 = vmul.f32 0.00390625, %v250_v28 }
  0xda   : > { %v252_v34 = vmul.f32 0.00390625, %v244_v33 }
  0xdb   : > { %v295_v48 = vrot.slane %v254_v41, %v294_v40 }
  0xdc   : > { %v281_v37 = vrot.slane %v252_v34, %v280_v29  ;;  %v260_v38 = vpop.xlane.xlu1 %259 }
  0xdd   : > { %v257_v42 = vpop.xlane.xlu0 %256  ;;  %v310_v44 = vrot.slane %v260_v38, %v280_v29 }
  0xde   : > { %v283_v43 = vsel %vm282_vm1, %v281_v37, %v276_v39  ;;  %v306_v45 = vrot.slane %v257_v42, %v275_v30 }
  0xdf   : > { %v290_v52 = vsel %vm289_vm2, %v288_v46, %v283_v43 }
  0xe0   : > { %v266_v47 = vpop.xlane.xlu1 %265  ;;  %v311_v53 = vsel %vm282_vm1, %v310_v44, %v306_v45  ;;  %v297_v56 = vsel %vm296_vm3, %v295_v48, %v290_v52 }
  0xe1   : > { %v263_v49 = vpop.xlane.xlu0 %262  ;;  %v320_v50 = vrot.slane %v266_v47, %v294_v40 }
  0xe2   : > { %v315_v51 = vrot.slane %v263_v49, %v287_v35 }
  0xe4   : > { %v316_v54 = vsel %vm289_vm2, %v315_v51, %v311_v53 }
  0xe5   : > { %v321_v55 = vsel %vm296_vm3, %v320_v50, %v316_v54 }
  0xe6   : > { %v324_v57 = vsel %vm323_vm4, %v297_v56, %v321_v55  ;;  %v1572_v56 = vld [vmem:[#allocation5 + $0x10] sm:$0xff] }
  0xe7   : > { %1080 = vmatmul.mubr.msk.f32.vlgmr.msra.gmra.mxu0 %vm329_vm5, %v324_v57  ;;  %v1574_v57 = vld [vmem:[#allocation5 + $0x18] sm:$0xff] }
 0x1a7   : > { %v399_v59 = vpop.f32.mrf.mxu0 }
 0x1a8   : > { %v403_v60 = vmax.f32 %v399_v59, 0.0 }
 0x1a9   : > { %v1081_v61 = vpop.f32.mrf.mxu0 }
 0x1aa   : > { %1085 = vmatmul.mubr.msk.f32.vlgmr.msra.gmra.mxu1 %vm405_vm6, %v403_v60 }
 0x26a   : > { %v475_v62 = vpop.f32.mrf.mxu1 }
 0x26b   : > { %v480_v63 = vrot.slane %v475_v62, 1 }
 0x26c   : > { %v1086_v3 = vpop.f32.mrf.mxu1 }
 0x26d   : > { %v482_v7 = vadd.f32 %v480_v63, %v475_v62  ;;  %v1576_v62 = vld [vmem:[#allocation5] sm:$0xff]  ;;  %v1578_v63 = vld [vmem:[#allocation5 + $0x8] sm:$0xff] }
 0x26f   : > { %v1054_v10 = vmul.f32 -1.442695, %v482_v7 }
 0x271   : > { %1157 = vpow2.f32 %v1054_v10 }
 0x27e   : > { %v1158_v11 = vpop.eup %1157 }
 0x27f   : > { %v486_v12 = vadd.f32 1.0, %v1158_v11 }
 0x281   : > { %1159 = vrcp.f32 %v486_v12 }
 0x28e   : > { %v1160_v14 = vpop.eup %1159 }
 0x28f   : > { %v492_v15 = vrot.slane %v1160_v14, %v491_v13 }
 0x291   : > { %498 = vbcast.lane.b32.xlu1 %v492_v15, 264  ;;  %494 = vbcast.lane.b32.xlu0 %v492_v15, 256 }
 0x295   : > { %502 = vbcast.lane.b32.xlu1 %v492_v15, 272 }
 0x299   : > { %506 = vbcast.lane.b32.xlu1 %v492_v15, 280 }
 0x303   : > { %v499_v16 = vpop.permute.xlu1 %498  ;;  %v495_v17 = vpop.permute.xlu0 %494 }
 0x304   : > { %v1533_v18 = vmul.f32 %v499_v16, %v1486_v8  ;;  %v1536_v19 = vmul.f32 %v499_v16, %v1488_v9  ;;  %v1539_v20 = vmul.f32 %v495_v17, %v1474_v2  ;;  %v1542_v21 = vmul.f32 %v495_v17, %v1478_v4 }
 0x306   : > { %v516_v8 = vadd.f32 %v1533_v18, %v1539_v20  ;;  %v525_v9 = vadd.f32 %v1536_v19, %v1542_v21 }
 0x307   : > { %v503_v23 = vpop.permute.xlu1 %502 }
 0x308   : > { %v1545_v24 = vmul.f32 %v503_v23, %v1470_v0  ;;  %v1548_v26 = vmul.f32 %v503_v23, %v1472_v1 }
 0x30a   : > { %v517_v2 = vadd.f32 %v516_v8, %v1545_v24  ;;  %v526_v28 = vadd.f32 %v525_v9, %v1548_v26  ;;  %v536_v1 = vmax.f32 %v1539_v20, %v1545_v24  ;;  %v545_v29 = vmax.f32 %v1542_v21, %v1548_v26 }
 0x30b   : > { %v507_v27 = vpop.permute.xlu1 %506 }
 0x30c   : > { %v1557_v4 = vmul.f32 %v507_v27, %v1480_v5  ;;  %v1560_v0 = vmul.f32 %v507_v27, %v1482_v6 }
 0x30e   : > { %v518_v30 = vadd.f32 %v517_v2, %v1557_v4  ;;  %v527_v31 = vadd.f32 %v526_v28, %v1560_v0  ;;  %v537_v32 = vmax.f32 %v1533_v18, %v1557_v4  ;;  %v546_v5 = vmax.f32 %v1536_v19, %v1560_v0 }
 0x310   : > { %v519_v33 = vrot.slane %v518_v30, 4  ;;  %v528_v34 = vrot.slane %v527_v31, 4  ;;  %v538_v6 = vmax.f32 %v536_v1, %v537_v32  ;;  %v547_v35 = vmax.f32 %v545_v29, %v546_v5 }
 0x312   : > { %v520_v36 = vadd.f32 %v519_v33, %v518_v30  ;;  %v529_v37 = vadd.f32 %v528_v34, %v527_v31  ;;  %v539_v38 = vrot.slane %v538_v6, 4  ;;  %v548_v39 = vrot.slane %v547_v35, 4 }
 0x314   : > { %v521_v40 = vrot.slane %v520_v36, 2  ;;  %v530_v41 = vrot.slane %v529_v37, 2  ;;  %v540_v42 = vmax.f32 %v538_v6, %v539_v38  ;;  %v549_v43 = vmax.f32 %v547_v35, %v548_v39 }
 0x316   : > { %v522_v44 = vadd.f32 %v521_v40, %v520_v36  ;;  %v531_v45 = vadd.f32 %v530_v41, %v529_v37  ;;  %v541_v46 = vrot.slane %v540_v42, 2  ;;  %v550_v47 = vrot.slane %v549_v43, 2 }
 0x318   : > { %v523_v48 = vrot.slane %v522_v44, 1  ;;  %v532_v49 = vrot.slane %v531_v45, 1  ;;  %v542_v50 = vmax.f32 %v540_v42, %v541_v46  ;;  %v551_v51 = vmax.f32 %v549_v43, %v550_v47 }
 0x31a   : > { %v524_v52 = vadd.f32 %v523_v48, %v522_v44  ;;  %v533_v53 = vadd.f32 %v532_v49, %v531_v45  ;;  %v543_v54 = vrot.slane %v542_v50, 1  ;;  %v552_v55 = vrot.slane %v551_v51, 1 }
 0x31c   : > { %v534_v58 = vmul.f32 0.03125, %v524_v52  ;;  %v535_v59 = vmul.f32 0.03125, %v533_v53  ;;  %v544_v60 = vmax.f32 %v542_v50, %v543_v54  ;;  %v553_v61 = vmax.f32 %v551_v51, %v552_v55 }
 0x31e   : > { %591 = vrot.lane.b32.xlu1 %v553_v61, %s1299_s20  ;;  %589 = vrot.lane.b32.xlu0 %v544_v60, %s1299_s20  ;;  %v562_v3 = vmul.f32 %v1572_v56, %v544_v60  ;;  %v563_v7 = vmul.f32 %v1574_v57, %v553_v61  ;;  %v561_v10 = vmul.f32 %v1578_v63, %v535_v59 }
 0x31f   : > { %v560_v13 = vmul.f32 %v1576_v62, %v534_v58 }
 0x320   : > { %v566_v11 = vrot.slane %v562_v3, 1  ;;  %v567_v12 = vrot.slane %v563_v7, 1 }
 0x322   : > { %636 = vrot.lane.b32.xlu1 %v553_v61, %s1300_s25  ;;  %634 = vrot.lane.b32.xlu0 %v544_v60, %s1300_s25  ;;  %v1586_v14 = vadd.f32 %v567_v12, %v561_v10  ;;  %v1588_v15 = vadd.f32 %v566_v11, %v560_v13 }
 0x326   : > { %681 = vrot.lane.b32.xlu1 %v553_v61, %s1301_s7  ;;  %679 = vrot.lane.b32.xlu0 %v544_v60, %s1301_s7 }
 0x32a   : > { %726 = vrot.lane.b32.xlu1 %v553_v61, %s1302_s12  ;;  %724 = vrot.lane.b32.xlu0 %v544_v60, %s1302_s12 }
 0x32e   : > { %765 = vrot.lane.b32.xlu1 %v553_v61, %s1303_s28  ;;  %763 = vrot.lane.b32.xlu0 %v544_v60, %s1303_s28 }
 0x332   : > { %810 = vrot.lane.b32.xlu1 %v553_v61, %s1304_s21  ;;  %808 = vrot.lane.b32.xlu0 %v544_v60, %s1304_s21 }
 0x336   : > { %855 = vrot.lane.b32.xlu1 %v553_v61, %s1305_s23  ;;  %853 = vrot.lane.b32.xlu0 %v544_v60, %s1305_s23 }
 0x33a   : > { %574 = vrot.lane.b32.xlu1 %v535_v59, %s1299_s20  ;;  %572 = vrot.lane.b32.xlu0 %v534_v58, %s1299_s20  ;;  %s1227_s20 = sshll.u32 %s1307_s11, 4  ;;  %s1228_s20 = int_to_ptr.vmem [resolvable:$false] %s1227_s20 }
 0x33b   : > { %p1230_p10 = scmp.lt.s32.totalorder %s1727_s26, %s1228_s20 }
 0x33e   : > { %613 = vrot.lane.b32.xlu1 %v535_v59, %s1300_s25  ;;  %611 = vrot.lane.b32.xlu0 %v534_v58, %s1300_s25 }
 0x342   : > { %658 = vrot.lane.b32.xlu1 %v535_v59, %s1301_s7  ;;  %656 = vrot.lane.b32.xlu0 %v534_v58, %s1301_s7  ;;  %s1229_s7 = scalar_lea.vmem %s1228_s20, 2048 }
 0x343   : > { %p1231_p12 = scmp.lt.s32.totalorder %s1229_s7, %s1223_s8 }
 0x345   : > { %p1232_p13 = por %p1231_p12, %p1230_p10 }
 0x346   : > { %703 = vrot.lane.b32.xlu1 %v535_v59, %s1302_s12  ;;  %701 = vrot.lane.b32.xlu0 %v534_v58, %s1302_s12 }
 0x347   : > { %p1233_p0 = pnand %p1232_p13, %p1226_p9 }
 0x34a   : > { %742 = vrot.lane.b32.xlu1 %v535_v59, %s1303_s28  ;;  %740 = vrot.lane.b32.xlu0 %v534_v58, %s1303_s28 }
 0x34e   : > { %787 = vrot.lane.b32.xlu1 %v535_v59, %s1304_s21  ;;  %785 = vrot.lane.b32.xlu0 %v534_v58, %s1304_s21 }
 0x352   : > { %832 = vrot.lane.b32.xlu1 %v535_v59, %s1305_s23  ;;  %830 = vrot.lane.b32.xlu0 %v534_v58, %s1305_s23 }
 0x356   : > { %871 = vrot.lane.b32.xlu1 %v535_v59, %s1306_s5  ;;  %869 = vrot.lane.b32.xlu0 %v534_v58, %s1306_s5 }
 0x35a   : > { %888 = vrot.lane.b32.xlu1 %v553_v61, %s1306_s5  ;;  %886 = vrot.lane.b32.xlu0 %v544_v60, %s1306_s5 }
 0x390   : > { %v592_v16 = vpop.permute.xlu1 %591  ;;  %v590_v17 = vpop.permute.xlu0 %589 }
 0x391   : > { %v593_v30 = vsel %vm576_vm7, %v590_v17, %v592_v16  ;;  %v594_v31 = vsel %vm576_vm7, %v592_v16, %v590_v17 }
 0x392   : > { %v597_v6 = vrot.slane %v594_v31, 7  ;;  %v598_v35 = vrot.slane %v593_v30, 7 }
 0x394   : > { %v637_v23 = vpop.permute.xlu1 %636  ;;  %v635_v8 = vpop.permute.xlu0 %634  ;;  %v601_v40 = vmul.f32 %v597_v6, %v1572_v56  ;;  %v602_v41 = vmul.f32 %v598_v35, %v1574_v57 }
 0x395   : > { %v638_v33 = vsel %vm615_vm8, %v635_v8, %v637_v23  ;;  %v639_v34 = vsel %vm615_vm8, %v637_v23, %v635_v8 }
 0x396   : > { %v642_v38 = vrot.slane %v639_v34, 6  ;;  %v643_v39 = vrot.slane %v638_v33, 6  ;;  %v605_v52 = vrot.slane %v601_v40, 5  ;;  %v606_v53 = vrot.slane %v602_v41, 5 }
 0x398   : > { %v682_v9 = vpop.permute.xlu1 %681  ;;  %v680_v27 = vpop.permute.xlu0 %679  ;;  %v646_v46 = vmul.f32 %v642_v38, %v1572_v56  ;;  %v647_v47 = vmul.f32 %v643_v39, %v1574_v57 }
 0x399   : > { %v683_v42 = vsel %vm660_vm9, %v680_v27, %v682_v9  ;;  %v684_v43 = vsel %vm660_vm9, %v682_v9, %v680_v27 }
 0x39a   : > { %v687_v54 = vrot.slane %v684_v43, 5  ;;  %v688_v55 = vrot.slane %v683_v42, 5  ;;  %v650_v10 = vrot.slane %v646_v46, 6  ;;  %v651_v11 = vrot.slane %v647_v47, 6 }
 0x39c   : > { %v727_v2 = vpop.permute.xlu1 %726  ;;  %v725_v28 = vpop.permute.xlu0 %724  ;;  %v691_v9 = vmul.f32 %v687_v54, %v1572_v56  ;;  %v692_v27 = vmul.f32 %v688_v55, %v1574_v57 }
 0x39d   : > { %v728_v58 = vsel %vm705_vm10, %v725_v28, %v727_v2  ;;  %v729_v59 = vsel %vm705_vm10, %v727_v2, %v725_v28 }
 0x39e   : > { %v732_v2 = vrot.slane %v729_v59, 4  ;;  %v733_v28 = vrot.slane %v728_v58, 4 }
 0x3a0   : > { %v766_v1 = vpop.permute.xlu1 %765  ;;  %v764_v29 = vpop.permute.xlu0 %763 }
 0x3a1   : > { %v767_v30 = vsel %vm744_vm11, %v764_v29, %v766_v1  ;;  %v768_v31 = vsel %vm744_vm11, %v766_v1, %v764_v29  ;;  %v696_v1 = vrot.slane %v692_v27, 7 }
 0x3a2   : > { %v771_v29 = vrot.slane %v767_v30, 2 }
 0x3a4   : > { %v1598_v32 = vpop.permute.xlu1 %810  ;;  %v1600_v5 = vpop.permute.xlu0 %808 }
 0x3a8   : > { %v1606_v36 = vpop.permute.xlu1 %855  ;;  %v1608_v37 = vpop.permute.xlu0 %853 }
 0x3ac   : > { %v575_v44 = vpop.permute.xlu1 %574  ;;  %v573_v45 = vpop.permute.xlu0 %572 }
 0x3ad   : > { %v577_v48 = vsel %vm576_vm7, %v573_v45, %v575_v44  ;;  %v578_v49 = vsel %vm576_vm7, %v575_v44, %v573_v45  ;;  %v695_v44 = vrot.slane %v691_v9, 7  ;;  %v772_v45 = vrot.slane %v768_v31, 2 }
 0x3ae   : > { %v579_v50 = vmul.f32 %v578_v49, %v1576_v62  ;;  %v580_v51 = vmul.f32 %v577_v48, %v1578_v63 }
 0x3b0   : > { %v583_v60 = vrot.slane %v579_v50, 4  ;;  %v584_v61 = vrot.slane %v580_v51, 4  ;;  %v614_v3 = vpop.permute.xlu1 %613  ;;  %v612_v7 = vpop.permute.xlu0 %611 }
 0x3b1   : > { %v616_v12 = vsel %vm615_vm8, %v612_v7, %v614_v3  ;;  %v617_v13 = vsel %vm615_vm8, %v614_v3, %v612_v7  ;;  %v775_v3 = vmul.f32 %v771_v29, %v1572_v56  ;;  %v776_v7 = vmul.f32 %v772_v45, %v1574_v57 }
 0x3b2   : > { %v587_v16 = vadd.f32 %v583_v60, %v1588_v15  ;;  %v588_v17 = vadd.f32 %v584_v61, %v1586_v14  ;;  %v620_v23 = vrot.slane %v617_v13, 7  ;;  %v621_v8 = vrot.slane %v616_v12, 7 }
 0x3b4   : > { %v624_v33 = vmul.f32 %v620_v23, %v1576_v62  ;;  %v625_v15 = vmul.f32 %v621_v8, %v1578_v63  ;;  %v659_v34 = vpop.permute.xlu1 %658  ;;  %v657_v14 = vpop.permute.xlu0 %656  ;;  %v609_v6 = vadd.f32 %v605_v52, %v587_v16  ;;  %v610_v35 = vadd.f32 %v606_v53, %v588_v17 }
 0x3b5   : > { %v661_v38 = vsel %vm660_vm9, %v657_v14, %v659_v34  ;;  %v662_v39 = vsel %vm660_vm9, %v659_v34, %v657_v14  ;;  %v736_v52 = vmul.f32 %v732_v2, %v1572_v56  ;;  %v737_v53 = vmul.f32 %v733_v28, %v1574_v57 }
 0x3b6   : > { %v628_v40 = vrot.slane %v624_v33, 5  ;;  %v629_v41 = vrot.slane %v625_v15, 5  ;;  %v665_v42 = vrot.slane %v662_v39, 6  ;;  %v666_v43 = vrot.slane %v661_v38, 6 }
 0x3b7   : > { %v812_v16 = vsel %vm789_vm12, %v1600_v5, %v1598_v32  ;;  %v813_v17 = vsel %vm789_vm12, %v1598_v32, %v1600_v5 }
 0x3b8   : > { %v632_v46 = vadd.f32 %v628_v40, %v609_v6  ;;  %v633_v47 = vadd.f32 %v629_v41, %v610_v35  ;;  %v669_v48 = vmul.f32 %v665_v42, %v1576_v62  ;;  %v670_v49 = vmul.f32 %v666_v43, %v1578_v63  ;;  %v704_v50 = vpop.permute.xlu1 %703  ;;  %v702_v51 = vpop.permute.xlu0 %701 }
 0x3b9   : > { %v706_v54 = vsel %vm705_vm10, %v702_v51, %v704_v50  ;;  %v707_v55 = vsel %vm705_vm10, %v704_v50, %v702_v51  ;;  %v816_v32 = vrot.slane %v812_v16, 1  ;;  %v817_v5 = vrot.slane %v813_v17, 1 }
 0x3ba   : > { %v655_v58 = vadd.f32 %v651_v11, %v633_v47  ;;  %v654_v59 = vadd.f32 %v650_v10, %v632_v46  ;;  %v673_v60 = vrot.slane %v669_v48, 6  ;;  %v674_v61 = vrot.slane %v670_v49, 6 }
 0x3bb   : > { %v710_v12 = vrot.slane %v707_v55, 5  ;;  %v711_v13 = vrot.slane %v706_v54, 5  ;;  %v779_v6 = vrot.slane %v775_v3, 2  ;;  %v780_v35 = vrot.slane %v776_v7, 2  ;;  %v558_v3 = vld [vmem:[#allocation5 + $0x20] sm:$0x3] }
 0x3bc   : > { %v677_v11 = vadd.f32 %v673_v60, %v654_v59  ;;  %v678_v10 = vadd.f32 %v674_v61, %v655_v58  ;;  %v743_v23 = vpop.permute.xlu1 %742  ;;  %v741_v8 = vpop.permute.xlu0 %740  ;;  %v820_v48 = vmul.f32 %v816_v32, %v1572_v56  ;;  %v821_v49 = vmul.f32 %v817_v5, %v1574_v57  ;;  %v559_v7 = vld [vmem:[#allocation5 + $0x28] sm:$0x3] }
 0x3bd   : > { %v714_v9 = vmul.f32 %v710_v12, %v1576_v62  ;;  %v715_v27 = vmul.f32 %v711_v13, %v1578_v63  ;;  %v745_v2 = vsel %vm744_vm11, %v741_v8, %v743_v23  ;;  %v746_v28 = vsel %vm744_vm11, %v743_v23, %v741_v8 }
 0x3be   : > { %v700_v30 = vadd.f32 %v696_v1, %v678_v10  ;;  %v699_v31 = vadd.f32 %v695_v44, %v677_v11  ;;  %v749_v33 = vrot.slane %v745_v2, 3  ;;  %v750_v15 = vrot.slane %v746_v28, 3 }
 0x3bf   : > { %v718_v34 = vrot.slane %v714_v9, 7  ;;  %v719_v14 = vrot.slane %v715_v27, 7  ;;  %v857_v54 = vsel %vm834_vm13, %v1608_v37, %v1606_v36  ;;  %v858_v55 = vsel %vm834_vm13, %v1606_v36, %v1608_v37 }
 0x3c0   : > { %v753_v38 = vmul.f32 %v749_v33, %v1576_v62  ;;  %v754_v39 = vmul.f32 %v750_v15, %v1578_v63  ;;  %v788_v40 = vpop.permute.xlu1 %787  ;;  %v786_v41 = vpop.permute.xlu0 %785  ;;  %v824_v37 = vrot.slane %v820_v48, 3  ;;  %v825_v10 = vrot.slane %v821_v49, 3 }
 0x3c1   : > { %v722_v42 = vadd.f32 %v718_v34, %v699_v31  ;;  %v723_v43 = vadd.f32 %v719_v14, %v700_v30  ;;  %v790_v44 = vsel %vm789_vm12, %v786_v41, %v788_v40  ;;  %v791_v1 = vsel %vm789_vm12, %v788_v40, %v786_v41 }
 0x3c2   : > { %v757_v29 = vrot.slane %v753_v38, 1  ;;  %v758_v45 = vrot.slane %v754_v39, 1  ;;  %v794_v46 = vrot.slane %v790_v44, 2  ;;  %v795_v47 = vrot.slane %v791_v1, 2 }
 0x3c3   : > { %v739_v50 = vadd.f32 %v737_v53, %v723_v43  ;;  %v738_v51 = vadd.f32 %v736_v52, %v722_v42  ;;  %v859_v9 = vmul.f32 %v857_v54, %v558_v3  ;;  %v860_v27 = vmul.f32 %v858_v55, %v559_v7 }
 0x3c4   : > { %v798_v58 = vmul.f32 %v794_v46, %v1576_v62  ;;  %v799_v59 = vmul.f32 %v795_v47, %v1578_v63  ;;  %v833_v60 = vpop.permute.xlu1 %832  ;;  %v831_v61 = vpop.permute.xlu0 %830 }
 0x3c5   : > { %v761_v53 = vadd.f32 %v757_v29, %v738_v51  ;;  %v762_v52 = vadd.f32 %v758_v45, %v739_v50  ;;  %v835_v12 = vsel %vm834_vm13, %v831_v61, %v833_v60  ;;  %v836_v13 = vsel %vm834_vm13, %v833_v60, %v831_v61 }
 0x3c6   : > { %v802_v16 = vrot.slane %v798_v58, 2  ;;  %v803_v17 = vrot.slane %v799_v59, 2  ;;  %v839_v11 = vrot.slane %v835_v12, 1  ;;  %v840_v36 = vrot.slane %v836_v13, 1 }
 0x3c7   : > { %v784_v23 = vadd.f32 %v780_v35, %v762_v52  ;;  %v783_v8 = vadd.f32 %v779_v6, %v761_v53  ;;  %v863_v38 = vrot.slane %v859_v9, 4  ;;  %v864_v39 = vrot.slane %v860_v27, 4 }
 0x3c8   : > { %v843_v2 = vmul.f32 %v839_v11, %v1576_v62  ;;  %v844_v28 = vmul.f32 %v840_v36, %v1578_v63  ;;  %v872_v30 = vpop.permute.xlu1 %871  ;;  %v870_v31 = vpop.permute.xlu0 %869 }
 0x3c9   : > { %v806_v33 = vadd.f32 %v802_v16, %v783_v8  ;;  %v807_v15 = vadd.f32 %v803_v17, %v784_v23  ;;  %v874_v32 = vsel %vm873_vm14, %v870_v31, %v872_v30  ;;  %v875_v5 = vsel %vm873_vm14, %v872_v30, %v870_v31 }
 0x3ca   : > { %v847_v34 = vrot.slane %v843_v2, 3  ;;  %v848_v14 = vrot.slane %v844_v28, 3  ;;  %v876_v62 = vmul.f32 %v874_v32, %v1572_v56  ;;  %v877_v63 = vmul.f32 %v875_v5, %v1574_v57 }
 0x3cb   : > { %v829_v35 = vadd.f32 %v825_v10, %v807_v15  ;;  %v828_v6 = vadd.f32 %v824_v37, %v806_v33 }
 0x3cc   : > { %v889_v40 = vpop.permute.xlu1 %888  ;;  %v887_v41 = vpop.permute.xlu0 %886  ;;  %v880_v48 = vrot.slane %v876_v62, 4  ;;  %v881_v49 = vrot.slane %v877_v63, 4 }
 0x3cd   : > { %v851_v42 = vadd.f32 %v847_v34, %v828_v6  ;;  %v852_v43 = vadd.f32 %v848_v14, %v829_v35  ;;  %v890_v44 = vsel %vm873_vm14, %v887_v41, %v889_v40  ;;  %v891_v1 = vsel %vm873_vm14, %v889_v40, %v887_v41 }
 0x3ce   : > { %v894_v29 = vrot.slane %v890_v44, 7  ;;  %v895_v45 = vrot.slane %v891_v1, 7 }
 0x3cf   : > { %v868_v46 = vadd.f32 %v864_v39, %v852_v43  ;;  %v867_v47 = vadd.f32 %v863_v38, %v851_v42 }
 0x3d0   : > { %v898_v50 = vmul.f32 %v894_v29, %v558_v3  ;;  %v899_v56 = vmul.f32 %v895_v45, %v559_v7  ;;  %v922_v3 = vsub.s32 4, %v1517_v25 }
 0x3d1   : > { %v884_v51 = vadd.f32 %v880_v48, %v867_v47  ;;  %v885_v57 = vadd.f32 %v881_v49, %v868_v46 }
 0x3d2   : > { %v902_v54 = vrot.slane %v898_v50, 5  ;;  %v903_v55 = vrot.slane %v899_v56, 5 }
 0x3d4   : > { %v906_v58 = vadd.f32 %v902_v54, %v884_v51  ;;  %v907_v59 = vadd.f32 %v903_v55, %v885_v57 }
 0x3d6   : > { %v1055_v60 = vmul.f32 -1.442695, %v906_v58  ;;  %v1056_v61 = vmul.f32 -1.442695, %v907_v59 }
 0x3d8   : > { %1161 = vpow2.f32 %v1055_v60 }
 0x3d9   : > { %1163 = vpow2.f32 %v1056_v61 }
 0x3e5   : > { %v1162_v22 = vpop.eup %1161 }
 0x3e6   : > { %v1164_v53 = vpop.eup %1163  ;;  %v914_v52 = vadd.f32 1.0, %v1162_v22 }
 0x3e7   : > { %v915_v12 = vadd.f32 1.0, %v1164_v53 }
 0x3e8   : > { %1165 = vrcp.f32 %v914_v52 }
 0x3e9   : > { %1167 = vrcp.f32 %v915_v12 }
 0x3f5   : > { %v1166_v7 = vpop.eup %1165 }
 0x3f6   : > { %v1168_v13 = vpop.eup %1167  ;;  %v923_v16 = vrot.slane %v1166_v7, %v922_v3 }
 0x3f7   : > { %v927_v17 = vrot.slane %v1168_v13, %v922_v3 }
 0x3f8   : > { %v928_v11 = vmul.f32 %v923_v16, %v1539_v20  ;;  %v930_v36 = vmul.f32 %v923_v16, %v1533_v18  ;;  %v932_v37 = vmul.f32 %v923_v16, %v1545_v24  ;;  %v934_v10 = vmul.f32 %v923_v16, %v1557_v4 }
 0x3f9   : > { %v929_v25 = vmul.f32 %v927_v17, %v1542_v21  ;;  %v931_v23 = vmul.f32 %v927_v17, %v1536_v19  ;;  %v933_v8 = vmul.f32 %v927_v17, %v1548_v26  ;;  %v935_v20 = vmul.f32 %v927_v17, %v1560_v0 }
 0x3fa   : > { %936 = vst [vmem:[%s230_s24] sm:$0xff] %v928_v11  ;;  %938 = vst [vmem:[%s230_s24 + $0x10] sm:$0xff] %v930_v36 }
 0x3fb   : > { %940 = vst [vmem:[%s230_s24 + $0x20] sm:$0xff] %v932_v37  ;;  %942 = vst [vmem:[%s230_s24 + $0x30] sm:$0xff] %v934_v10 }
 0x3fc   : > { %937 = vst [vmem:[%s230_s24 + $0x8] sm:$0xff] %v929_v25  ;;  %939 = vst [vmem:[%s230_s24 + $0x18] sm:$0xff] %v931_v23 }
 0x3fd   : > { %941 = vst [vmem:[%s230_s24 + $0x28] sm:$0xff] %v933_v8  ;;  %943 = vst [vmem:[%s230_s24 + $0x38] sm:$0xff] %v935_v20 }
 0x3fe   : > { %1236 = shalt.err (!%p1233_p0)
}
 0x3ff   : > { %s1237_s12 = scalar_lea.hbm %s1721_s14, 1024  ;;  %s1241_s23 = scalar_lea.hbm %s1775_s4, 2048 }
 0x400   : > { %p1238_p5 = scmp.ne.s32.totalorder %s1721_s14, %s1237_s12  ;;  %p1242_p4 = scmp.lt.s32.totalorder %s1721_s14, %s1775_s4 }
 0x401   : > { %p1243_p6 = scmp.lt.s32.totalorder %s1241_s23, %s1237_s12 }
 0x402   : > { %p1239_p2 = pnand %p1238_p5, %p1791_p11 }
 0x403   : > { %p1244_p8 = por %p1243_p6, %p1242_p4 }
 0x404   : > { %p1240_p1 = pneg %p1239_p2 }
 0x406   : > { %p1245_p3 = pnand %p1244_p8, %p1240_p1 }
 0x408   : > { %1248 = shalt.err (!%p1245_p3)
}
 0x409   : > { %s1308_s24 = smov 256  }
 0x40a   : > { %1093 = dma.vmem_to_hbm [thread:$0]  (%p1791_p11), %s1727_s26, 1024, %s1721_s14, %s945_s19, %s1308_s24, %s1308_s24, %s1300_s25  }
 0x40b PF: > { %s973_s29 = sand.u32 1, %s1279_s15   ;;  %p1792_p7 = scmp.ne.s32.totalorder %s1781_s22, 0 }
 0x40c   : > { %p1793_p9 = scmp.ge.s32.totalorder %s1291_s18, 2  ;;  %s974_s13 = scalar_lea.sflag [#allocation4], %s973_s29 }
 0x40e   : > { %p1104_p10 = pnand %p1793_p9, %p1792_p7 }
 0x410   : > { %p1105_p12 = pneg %p1104_p10 }
 0x412   : > { %1274 = dma.done.wait (%p1105_p12), %s974_s13, 1024  }
 0x413   : > { %1276 = vsyncadd (%p1105_p12), %s974_s13, 4294966272  ;;  %p18_p13 = scmp.ge.s32.totalorder %s1388_s27, 4   ;;  %s1794_s15 = smov %s1283_s16 }
 0x414   : > { %s1795_s16 = smov %s1287_s17  ;;  %s1796_s17 = smov %s1408_s9 }
 0x415   : > { %s1797_s18 = smov %s1388_s27  ;;  %20 = sbr.rel (!%p18_p13) target bundleno = 6 (0x6), region = 85 }
 0x41a   :  { %979 = vsyncpa [#allocation3], 1 }
 0x41b   :  { %981 = vsyncpa [#allocation3 + $0x1], 1 }
 0x41c   :  { %982 = vsyncpa [#allocation6], 1 }
 0x41d   :  { %983 = vsyncpa [#allocation4], 1 }
 0x41e   :  { %985 = vsyncpa [#allocation4 + $0x1], 1 }

</bundles_post_ra>
